<compile_context>
chip_gen: v5e
topology: v5e:2x2
jax: 0.10.0
libtpu: 0.0.40
codegen_flags: <defaults>
</compile_context>

<pallas_src>
import math
import functools

import jax
import jax.numpy as jnp
from jax.experimental import pallas as pl
from jax.experimental.pallas import tpu as pltpu

_INV_SQRT2 = 1.0 / math.sqrt(2.0)


def _erf(x):
    # Abramowitz & Stegun 7.1.26 rational approximation, max abs err ~1.5e-7.
    a1, a2, a3, a4, a5 = 0.254829592, -0.284496736, 1.421413741, -1.453152027, 1.061405429
    p = 0.3275911
    s = jnp.where(x >= 0.0, 1.0, -1.0)
    ax = jnp.abs(x)
    t = 1.0 / (1.0 + p * ax)
    poly = ((((a5 * t + a4) * t + a3) * t + a2) * t + a1) * t
    return s * (1.0 - poly * jnp.exp(-ax * ax))


def _gelu_exact(x):
    # PyTorch nn.GELU() default is the exact (erf-based) GELU.
    return 0.5 * x * (1.0 + _erf(x * _INV_SQRT2))


def _fused_net_kernel(x_ref, p_ref, out_ref):
    x = x_ref[...]                 # (B, C, M)  -- channels on sublanes, pixels in lanes
    p = p_ref[...]                 # (2C, 3C+2) packed composed parameters
    B, C, M = x.shape
    C2 = p.shape[0]                # 2C

    # Static slices of the packed slab (zero runtime cost beyond a couple of selects).
    wA = p[:, :C]                            # (2C, C)
    bA = p[:, C:C + 1]                       # (2C, 1)
    wB = p[:C, C + 1:C + 1 + C2]             # (C, 2C)
    bB = p[:C, C + 1 + C2:C + 2 + C2]        # (C, 1)

    # Stage 1: hg = W_A @ x + b_A  as K=C broadcast FMAs on the VPU (MXU skipped on
    # purpose: with C=4 a dot wastes the systolic array and pays result-FIFO latency).
    hg = jnp.broadcast_to(bA[None], (B, C2, M))
    for k in range(C):                                   # static unroll, K is tiny
        hg = hg + wA[None, :, k:k + 1] * x[:, k:k + 1, :]

    g = _gelu_exact(hg)                                  # GELU on both fused halves

    # Stage 2: out = W_B @ gelu(...) + b_B  (K = 2C broadcast FMAs)
    y = jnp.broadcast_to(bB[None], (B, C, M))
    for k in range(C2):
        y = y + wB[None, :, k:k + 1] * g[:, k:k + 1, :]

    out_ref[...] = y.astype(out_ref.dtype)               # lane-dense store


def _fold_bn_into_conv(params, conv, bn, eps=1e-5):
    """Fold eval-mode BatchNorm into a 1x1 conv. Returns w:(Cout,Cin), b:(Cout,)."""
    w, b = params[conv + "_w"], params[conv + "_b"]
    gamma, beta = params[bn + "_gamma"], params[bn + "_beta"]
    mean, var = params[bn + "_mean"], params[bn + "_var"]
    scale = gamma / jnp.sqrt(var + eps)
    return w * scale[:, None], (b - mean) * scale + beta


def _prep_composed_params(params):
    """Fold BN and compose the whole post-GELU linear algebra into (W_A,b_A,W_B,b_B)."""
    wp1, bp1 = _fold_bn_into_conv(params, "pp_conv1", "pp_bn1")    # (C, C)
    wp2, bp2 = _fold_bn_into_conv(params, "pp_conv2", "pp_bn2")    # (C, C)
    wb1a, bb1a = _fold_bn_into_conv(params, "b1_conv1", "b1_bn1")  # (C, C)
    wb1b, bb1b = _fold_bn_into_conv(params, "b1_conv2", "b1_bn2")  # (2C, C)
    wb2, bb2 = _fold_bn_into_conv(params, "b2_conv1", "b2_bn1")    # (C, 2C)
    C = wp1.shape[0]

    # First fused stage: rows 0:C -> parallel-path pre-GELU, rows C:2C -> block1 pre-GELU.
    w_A = jnp.concatenate([wp1, wb1a], axis=0)                     # (2C, C)
    b_A = jnp.concatenate([bp1, bb1a], axis=0)                     # (2C,)

    # Second fused stage: out = Wb2[:, :C]@x1 + Wb2[:, C:]@x3 + bb2 + x2 composed into
    # a single (C, 2C) map acting on gelu([h; g]).
    wb1b_top, wb1b_bot = wb1b[:C, :], wb1b[C:, :]
    bb1b_top, bb1b_bot = bb1b[:C], bb1b[C:]
    wb2_x1, wb2_x3 = wb2[:, :C], wb2[:, C:]
    w_B_h = wb2_x3 @ wp2                                           # acts on gelu(h)
    w_B_g = wb2_x1 @ wb1b_top + wb1b_bot                           # acts on gelu(g)
    w_B = jnp.concatenate([w_B_h, w_B_g], axis=1)                  # (C, 2C)
    b_B = wb2_x1 @ bb1b_top + wb2_x3 @ bp2 + bb2 + bb1b_bot        # (C,)

    return (w_A.astype(jnp.float32), b_A.astype(jnp.float32),
            w_B.astype(jnp.float32), b_B.astype(jnp.float32))


def _pack_params(params):
    """Pack (W_A,b_A,W_B,b_B) into one (2C, 3C+2) f32 slab -> a single kernel operand."""
    w_A, b_A, w_B, b_B = _prep_composed_params(params)
    C2, C = w_A.shape
    slab = jnp.zeros((C2, 3 * C + 2), jnp.float32)
    slab = slab.at[:, :C].set(w_A)
    slab = slab.at[:, C].set(b_A)
    slab = slab.at[:C, C + 1:3 * C + 1].set(w_B)
    slab = slab.at[:C, 3 * C + 1].set(b_B)
    return slab


def net_forward(x_nchw, params, *, tm=None):
    """Pallas forward. x_nchw: (N, C, H, W) float32. Returns (N, C, H, W)."""
    N, C, H, W = x_nchw.shape
    HW = H * W
    # Free contiguous view: no transpose, pixels land in the lane dimension.
    x_ncm = x_nchw.reshape(N, C, HW).astype(jnp.float32)
    slab = _pack_params(params)
    pshape = slab.shape

    if tm is None:
        # Whole problem resident in VMEM: one grid step, one TensorCore.
        grid = (1,)
        in_specs = [pl.BlockSpec((N, C, HW), lambda i: (0, 0, 0)),
                    pl.BlockSpec(pshape, lambda i: (0, 0))]
        out_specs = pl.BlockSpec((N, C, HW), lambda i: (0, 0, 0))
        dims = ("arbitrary",)
    else:
        # Tiled path for large spatial sizes (not used at the test size).
        # TODO(synk): ragged HW tails need a cdiv grid + masking; keep it even here.
        assert HW % tm == 0 and tm % 128 == 0, (HW, tm)
        grid = (N, HW // tm)
        in_specs = [pl.BlockSpec((1, C, tm), lambda n, i: (n, 0, i)),
                    pl.BlockSpec(pshape, lambda n, i: (0, 0))]
        out_specs = pl.BlockSpec((1, C, tm), lambda n, i: (n, 0, i))
        dims = ("parallel", "parallel")

    out_ncm = pl.pallas_call(
        _fused_net_kernel,
        out_shape=jax.ShapeDtypeStruct((N, C, HW), jnp.float32),
        grid=grid,
        in_specs=in_specs,
        out_specs=out_specs,
        compiler_params=pltpu.CompilerParams(
            dimension_semantics=dims,
            vmem_limit_bytes=32 * 1024 * 1024),
    )(x_ncm, slab)

    return out_ncm.reshape(N, C, H, W)


def net_reference(x_nchw, params):
    """Pure-JAX reference following the module graph (folded eval-mode BN, exact GELU).

    Deliberately does NOT use the composed weights, so it validates the host-side
    weight composition performed for the kernel."""
    N, C, H, W = x_nchw.shape
    M = N * H * W
    x = jnp.transpose(x_nchw, (0, 2, 3, 1)).reshape(M, C).astype(jnp.float32)
    gelu = functools.partial(jax.nn.gelu, approximate=False)

    wp1, bp1 = _fold_bn_into_conv(params, "pp_conv1", "pp_bn1")
    wp2, bp2 = _fold_bn_into_conv(params, "pp_conv2", "pp_bn2")
    wb1a, bb1a = _fold_bn_into_conv(params, "b1_conv1", "b1_bn1")
    wb1b, bb1b = _fold_bn_into_conv(params, "b1_conv2", "b1_bn2")
    wb2, bb2 = _fold_bn_into_conv(params, "b2_conv1", "b2_bn1")

    x3 = gelu(x @ wp1.T + bp1) @ wp2.T + bp2
    h1 = gelu(x @ wb1a.T + bb1a) @ wb1b.T + bb1b
    x1, x2 = h1[:, :C], h1[:, C:]
    y = jnp.concatenate([x1, x3], axis=1) @ wb2.T + bb2
    out = y + x2
    return jnp.transpose(out.reshape(N, H, W, C), (0, 3, 1, 2))


def make_params(key, in_dim):
    """Deterministic parameter init matching the PyTorch module's shapes."""
    C = in_dim
    names_and_shapes = [
        # parallel_path
        ("pp_conv1_w", (C, C)), ("pp_conv1_b", (C,)),
        ("pp_bn1", C),
        ("pp_conv2_w", (C, C)), ("pp_conv2_b", (C,)),
        ("pp_bn2", C),
        # block1
        ("b1_conv1_w", (C, C)), ("b1_conv1_b", (C,)),
        ("b1_bn1", C),
        ("b1_conv2_w", (2 * C, C)), ("b1_conv2_b", (2 * C,)),
        ("b1_bn2", 2 * C),
        # block2
        ("b2_conv1_w", (C, 2 * C)), ("b2_conv1_b", (C,)),
        ("b2_bn1", C),
    ]
    params = {}
    for name, shp in names_and_shapes:
        if name.endswith("_w"):
            key, k = jax.random.split(key)
            fan_in = shp[1]
            params[name] = (jax.random.normal(k, shp, jnp.float32)
                            / jnp.sqrt(jnp.float32(fan_in)))
        elif name.endswith("_b"):
            key, k = jax.random.split(key)
            params[name] = 0.1 * jax.random.normal(k, shp, jnp.float32)
        else:  # BN param bundle
            n = shp
            key, k1, k2, k3, k4 = jax.random.split(key, 5)
            params[name + "_gamma"] = jax.random.uniform(k1, (n,), jnp.float32, 0.5, 1.5)
            params[name + "_beta"] = 0.1 * jax.random.normal(k2, (n,), jnp.float32)
            params[name + "_mean"] = 0.1 * jax.random.normal(k3, (n,), jnp.float32)
            params[name + "_var"] = jax.random.uniform(k4, (n,), jnp.float32, 0.5, 1.5)
    return params


if __name__ == "__main__":
    key = jax.random.PRNGKey(0)
    key, kx, kp = jax.random.split(key, 3)

    N, C, H, W = 2, 4, 16, 16            # batch=2, channels=4, spatial=16
    x = jax.random.normal(kx, (N, C, H, W), jnp.float32)
    params = make_params(kp, C)

    out = net_forward(x, params)
    out = jax.block_until_ready(out)

    ref = net_reference(x, params)
    assert out.shape == (N, C, H, W), out.shape
    # 1e-3 tolerance easily covers the A&S erf approximation (~1.5e-7 on erf, ~1e-6
    # end-to-end); any weight-composition bug would show up as an O(1) error.
    assert jnp.allclose(out, ref, atol=1e-3, rtol=1e-3), float(jnp.max(jnp.abs(out - ref)))

    print("KERNEL_OK")
</pallas_src>

<mosaic_0001>
module attributes {stable_mosaic.version = 11 : i64} {
  func.func @_fused_net_kernel(%arg0: i32, %arg1: memref<2x4x256xf32, #tpu.memory_space<vmem>>, %arg2: memref<8x14xf32, #tpu.memory_space<vmem>>, %arg3: memref<2x4x256xf32, #tpu.memory_space<vmem>>) attributes {dimension_semantics = [#tpu.dimension_semantics<arbitrary>], iteration_bounds = array<i64: 1>, scalar_prefetch = 0 : i64, scratch_operands = 0 : i64, tpu.core_type = #tpu.core_type<tc>, window_params = [{pipeline_mode = #tpu.pipeline_mode<synchronous>, transform_indices = @transform_0, window_bounds = array<i64: 2, 4, 256>}, {pipeline_mode = #tpu.pipeline_mode<synchronous>, transform_indices = @transform_1, window_bounds = array<i64: 8, 14>}, {pipeline_mode = #tpu.pipeline_mode<synchronous>, transform_indices = @transform_2, window_bounds = array<i64: 2, 4, 256>}]} {
    %c0 = arith.constant 0 : index
    %c0_0 = arith.constant 0 : index
    %c0_1 = arith.constant 0 : index
    %0 = vector.load %arg1[%c0, %c0_0, %c0_1] : memref<2x4x256xf32, #tpu.memory_space<vmem>>, vector<2x4x256xf32>
    %c0_2 = arith.constant 0 : index
    %c0_3 = arith.constant 0 : index
    %1 = vector.load %arg2[%c0_2, %c0_3] : memref<8x14xf32, #tpu.memory_space<vmem>>, vector<8x14xf32>
    %2 = vector.extract_strided_slice %1 {offsets = [0, 0], sizes = [8, 4], strides = [1, 1]} : vector<8x14xf32> to vector<8x4xf32>
    %3 = vector.extract_strided_slice %1 {offsets = [0, 4], sizes = [8, 1], strides = [1, 1]} : vector<8x14xf32> to vector<8x1xf32>
    %4 = vector.extract_strided_slice %1 {offsets = [0, 5], sizes = [4, 8], strides = [1, 1]} : vector<8x14xf32> to vector<4x8xf32>
    %5 = vector.extract_strided_slice %1 {offsets = [0, 13], sizes = [4, 1], strides = [1, 1]} : vector<8x14xf32> to vector<4x1xf32>
    %6 = vector.shape_cast %3 : vector<8x1xf32> to vector<1x8x1xf32>
    %7 = vector.shape_cast %6 : vector<1x8x1xf32> to vector<1x8x1xf32>
    %8 = vector.broadcast %7 : vector<1x8x1xf32> to vector<2x8x256xf32>
    %9 = vector.extract_strided_slice %2 {offsets = [0, 0], sizes = [8, 1], strides = [1, 1]} : vector<8x4xf32> to vector<8x1xf32>
    %10 = vector.shape_cast %9 : vector<8x1xf32> to vector<1x8x1xf32>
    %11 = vector.extract_strided_slice %0 {offsets = [0, 0, 0], sizes = [2, 1, 256], strides = [1, 1, 1]} : vector<2x4x256xf32> to vector<2x1x256xf32>
    %12 = vector.broadcast %10 : vector<1x8x1xf32> to vector<2x8x256xf32>
    %13 = vector.broadcast %11 : vector<2x1x256xf32> to vector<2x8x256xf32>
    %14 = arith.mulf %12, %13 : vector<2x8x256xf32>
    %15 = arith.addf %8, %14 : vector<2x8x256xf32>
    %16 = vector.extract_strided_slice %2 {offsets = [0, 1], sizes = [8, 1], strides = [1, 1]} : vector<8x4xf32> to vector<8x1xf32>
    %17 = vector.shape_cast %16 : vector<8x1xf32> to vector<1x8x1xf32>
    %18 = vector.extract_strided_slice %0 {offsets = [0, 1, 0], sizes = [2, 1, 256], strides = [1, 1, 1]} : vector<2x4x256xf32> to vector<2x1x256xf32>
    %19 = vector.broadcast %17 : vector<1x8x1xf32> to vector<2x8x256xf32>
    %20 = vector.broadcast %18 : vector<2x1x256xf32> to vector<2x8x256xf32>
    %21 = arith.mulf %19, %20 : vector<2x8x256xf32>
    %22 = arith.addf %15, %21 : vector<2x8x256xf32>
    %23 = vector.extract_strided_slice %2 {offsets = [0, 2], sizes = [8, 1], strides = [1, 1]} : vector<8x4xf32> to vector<8x1xf32>
    %24 = vector.shape_cast %23 : vector<8x1xf32> to vector<1x8x1xf32>
    %25 = vector.extract_strided_slice %0 {offsets = [0, 2, 0], sizes = [2, 1, 256], strides = [1, 1, 1]} : vector<2x4x256xf32> to vector<2x1x256xf32>
    %26 = vector.broadcast %24 : vector<1x8x1xf32> to vector<2x8x256xf32>
    %27 = vector.broadcast %25 : vector<2x1x256xf32> to vector<2x8x256xf32>
    %28 = arith.mulf %26, %27 : vector<2x8x256xf32>
    %29 = arith.addf %22, %28 : vector<2x8x256xf32>
    %30 = vector.extract_strided_slice %2 {offsets = [0, 3], sizes = [8, 1], strides = [1, 1]} : vector<8x4xf32> to vector<8x1xf32>
    %31 = vector.shape_cast %30 : vector<8x1xf32> to vector<1x8x1xf32>
    %32 = vector.extract_strided_slice %0 {offsets = [0, 3, 0], sizes = [2, 1, 256], strides = [1, 1, 1]} : vector<2x4x256xf32> to vector<2x1x256xf32>
    %33 = vector.broadcast %31 : vector<1x8x1xf32> to vector<2x8x256xf32>
    %34 = vector.broadcast %32 : vector<2x1x256xf32> to vector<2x8x256xf32>
    %35 = arith.mulf %33, %34 : vector<2x8x256xf32>
    %36 = arith.addf %29, %35 : vector<2x8x256xf32>
    %cst = arith.constant 5.000000e-01 : f32
    %37 = vector.broadcast %cst : f32 to vector<2x8x256xf32>
    %38 = arith.mulf %37, %36 : vector<2x8x256xf32>
    %cst_4 = arith.constant 0.707106769 : f32
    %39 = vector.broadcast %cst_4 : f32 to vector<2x8x256xf32>
    %40 = arith.mulf %36, %39 : vector<2x8x256xf32>
    %cst_5 = arith.constant 0.000000e+00 : f32
    %41 = vector.broadcast %cst_5 : f32 to vector<2x8x256xf32>
    %42 = arith.cmpf oge, %40, %41 : vector<2x8x256xf32>
    %cst_6 = arith.constant 1.000000e+00 : f32
    %cst_7 = arith.constant -1.000000e+00 : f32
    %43 = vector.broadcast %cst_6 : f32 to vector<2x8x256xf32>
    %44 = vector.broadcast %cst_7 : f32 to vector<2x8x256xf32>
    %45 = arith.select %42, %43, %44 : vector<2x8x256xi1>, vector<2x8x256xf32>
    %46 = math.absf %40 : vector<2x8x256xf32>
    %cst_8 = arith.constant 0.327591091 : f32
    %47 = vector.broadcast %cst_8 : f32 to vector<2x8x256xf32>
    %48 = arith.mulf %47, %46 : vector<2x8x256xf32>
    %cst_9 = arith.constant 1.000000e+00 : f32
    %49 = vector.broadcast %cst_9 : f32 to vector<2x8x256xf32>
    %50 = arith.addf %49, %48 : vector<2x8x256xf32>
    %cst_10 = arith.constant 1.000000e+00 : f32
    %51 = vector.broadcast %cst_10 : f32 to vector<2x8x256xf32>
    %52 = arith.divf %51, %50 : vector<2x8x256xf32>
    %cst_11 = arith.constant 1.06140542 : f32
    %53 = vector.broadcast %cst_11 : f32 to vector<2x8x256xf32>
    %54 = arith.mulf %53, %52 : vector<2x8x256xf32>
    %cst_12 = arith.constant -1.45315206 : f32
    %55 = vector.broadcast %cst_12 : f32 to vector<2x8x256xf32>
    %56 = arith.addf %54, %55 : vector<2x8x256xf32>
    %57 = arith.mulf %56, %52 : vector<2x8x256xf32>
    %cst_13 = arith.constant 1.42141378 : f32
    %58 = vector.broadcast %cst_13 : f32 to vector<2x8x256xf32>
    %59 = arith.addf %57, %58 : vector<2x8x256xf32>
    %60 = arith.mulf %59, %52 : vector<2x8x256xf32>
    %cst_14 = arith.constant -0.284496725 : f32
    %61 = vector.broadcast %cst_14 : f32 to vector<2x8x256xf32>
    %62 = arith.addf %60, %61 : vector<2x8x256xf32>
    %63 = arith.mulf %62, %52 : vector<2x8x256xf32>
    %cst_15 = arith.constant 0.254829586 : f32
    %64 = vector.broadcast %cst_15 : f32 to vector<2x8x256xf32>
    %65 = arith.addf %63, %64 : vector<2x8x256xf32>
    %66 = arith.mulf %65, %52 : vector<2x8x256xf32>
    %cst_16 = arith.constant 0.000000e+00 : f32
    %67 = vector.broadcast %cst_16 : f32 to vector<2x8x256xf32>
    %68 = arith.subf %67, %46 : vector<2x8x256xf32>
    %69 = arith.mulf %68, %46 : vector<2x8x256xf32>
    %70 = math.exp %69 : vector<2x8x256xf32>
    %71 = arith.mulf %66, %70 : vector<2x8x256xf32>
    %cst_17 = arith.constant 1.000000e+00 : f32
    %72 = vector.broadcast %cst_17 : f32 to vector<2x8x256xf32>
    %73 = arith.subf %72, %71 : vector<2x8x256xf32>
    %74 = arith.mulf %45, %73 : vector<2x8x256xf32>
    %cst_18 = arith.constant 1.000000e+00 : f32
    %75 = vector.broadcast %cst_18 : f32 to vector<2x8x256xf32>
    %76 = arith.addf %75, %74 : vector<2x8x256xf32>
    %77 = arith.mulf %38, %76 : vector<2x8x256xf32>
    %78 = vector.shape_cast %5 : vector<4x1xf32> to vector<1x4x1xf32>
    %79 = vector.shape_cast %78 : vector<1x4x1xf32> to vector<1x4x1xf32>
    %80 = vector.broadcast %79 : vector<1x4x1xf32> to vector<2x4x256xf32>
    %81 = vector.extract_strided_slice %4 {offsets = [0, 0], sizes = [4, 1], strides = [1, 1]} : vector<4x8xf32> to vector<4x1xf32>
    %82 = vector.shape_cast %81 : vector<4x1xf32> to vector<1x4x1xf32>
    %83 = vector.extract_strided_slice %77 {offsets = [0, 0, 0], sizes = [2, 1, 256], strides = [1, 1, 1]} : vector<2x8x256xf32> to vector<2x1x256xf32>
    %84 = vector.broadcast %82 : vector<1x4x1xf32> to vector<2x4x256xf32>
    %85 = vector.broadcast %83 : vector<2x1x256xf32> to vector<2x4x256xf32>
    %86 = arith.mulf %84, %85 : vector<2x4x256xf32>
    %87 = arith.addf %80, %86 : vector<2x4x256xf32>
    %88 = vector.extract_strided_slice %4 {offsets = [0, 1], sizes = [4, 1], strides = [1, 1]} : vector<4x8xf32> to vector<4x1xf32>
    %89 = vector.shape_cast %88 : vector<4x1xf32> to vector<1x4x1xf32>
    %90 = vector.extract_strided_slice %77 {offsets = [0, 1, 0], sizes = [2, 1, 256], strides = [1, 1, 1]} : vector<2x8x256xf32> to vector<2x1x256xf32>
    %91 = vector.broadcast %89 : vector<1x4x1xf32> to vector<2x4x256xf32>
    %92 = vector.broadcast %90 : vector<2x1x256xf32> to vector<2x4x256xf32>
    %93 = arith.mulf %91, %92 : vector<2x4x256xf32>
    %94 = arith.addf %87, %93 : vector<2x4x256xf32>
    %95 = vector.extract_strided_slice %4 {offsets = [0, 2], sizes = [4, 1], strides = [1, 1]} : vector<4x8xf32> to vector<4x1xf32>
    %96 = vector.shape_cast %95 : vector<4x1xf32> to vector<1x4x1xf32>
    %97 = vector.extract_strided_slice %77 {offsets = [0, 2, 0], sizes = [2, 1, 256], strides = [1, 1, 1]} : vector<2x8x256xf32> to vector<2x1x256xf32>
    %98 = vector.broadcast %96 : vector<1x4x1xf32> to vector<2x4x256xf32>
    %99 = vector.broadcast %97 : vector<2x1x256xf32> to vector<2x4x256xf32>
    %100 = arith.mulf %98, %99 : vector<2x4x256xf32>
    %101 = arith.addf %94, %100 : vector<2x4x256xf32>
    %102 = vector.extract_strided_slice %4 {offsets = [0, 3], sizes = [4, 1], strides = [1, 1]} : vector<4x8xf32> to vector<4x1xf32>
    %103 = vector.shape_cast %102 : vector<4x1xf32> to vector<1x4x1xf32>
    %104 = vector.extract_strided_slice %77 {offsets = [0, 3, 0], sizes = [2, 1, 256], strides = [1, 1, 1]} : vector<2x8x256xf32> to vector<2x1x256xf32>
    %105 = vector.broadcast %103 : vector<1x4x1xf32> to vector<2x4x256xf32>
    %106 = vector.broadcast %104 : vector<2x1x256xf32> to vector<2x4x256xf32>
    %107 = arith.mulf %105, %106 : vector<2x4x256xf32>
    %108 = arith.addf %101, %107 : vector<2x4x256xf32>
    %109 = vector.extract_strided_slice %4 {offsets = [0, 4], sizes = [4, 1], strides = [1, 1]} : vector<4x8xf32> to vector<4x1xf32>
    %110 = vector.shape_cast %109 : vector<4x1xf32> to vector<1x4x1xf32>
    %111 = vector.extract_strided_slice %77 {offsets = [0, 4, 0], sizes = [2, 1, 256], strides = [1, 1, 1]} : vector<2x8x256xf32> to vector<2x1x256xf32>
    %112 = vector.broadcast %110 : vector<1x4x1xf32> to vector<2x4x256xf32>
    %113 = vector.broadcast %111 : vector<2x1x256xf32> to vector<2x4x256xf32>
    %114 = arith.mulf %112, %113 : vector<2x4x256xf32>
    %115 = arith.addf %108, %114 : vector<2x4x256xf32>
    %116 = vector.extract_strided_slice %4 {offsets = [0, 5], sizes = [4, 1], strides = [1, 1]} : vector<4x8xf32> to vector<4x1xf32>
    %117 = vector.shape_cast %116 : vector<4x1xf32> to vector<1x4x1xf32>
    %118 = vector.extract_strided_slice %77 {offsets = [0, 5, 0], sizes = [2, 1, 256], strides = [1, 1, 1]} : vector<2x8x256xf32> to vector<2x1x256xf32>
    %119 = vector.broadcast %117 : vector<1x4x1xf32> to vector<2x4x256xf32>
    %120 = vector.broadcast %118 : vector<2x1x256xf32> to vector<2x4x256xf32>
    %121 = arith.mulf %119, %120 : vector<2x4x256xf32>
    %122 = arith.addf %115, %121 : vector<2x4x256xf32>
    %123 = vector.extract_strided_slice %4 {offsets = [0, 6], sizes = [4, 1], strides = [1, 1]} : vector<4x8xf32> to vector<4x1xf32>
    %124 = vector.shape_cast %123 : vector<4x1xf32> to vector<1x4x1xf32>
    %125 = vector.extract_strided_slice %77 {offsets = [0, 6, 0], sizes = [2, 1, 256], strides = [1, 1, 1]} : vector<2x8x256xf32> to vector<2x1x256xf32>
    %126 = vector.broadcast %124 : vector<1x4x1xf32> to vector<2x4x256xf32>
    %127 = vector.broadcast %125 : vector<2x1x256xf32> to vector<2x4x256xf32>
    %128 = arith.mulf %126, %127 : vector<2x4x256xf32>
    %129 = arith.addf %122, %128 : vector<2x4x256xf32>
    %130 = vector.extract_strided_slice %4 {offsets = [0, 7], sizes = [4, 1], strides = [1, 1]} : vector<4x8xf32> to vector<4x1xf32>
    %131 = vector.shape_cast %130 : vector<4x1xf32> to vector<1x4x1xf32>
    %132 = vector.extract_strided_slice %77 {offsets = [0, 7, 0], sizes = [2, 1, 256], strides = [1, 1, 1]} : vector<2x8x256xf32> to vector<2x1x256xf32>
    %133 = vector.broadcast %131 : vector<1x4x1xf32> to vector<2x4x256xf32>
    %134 = vector.broadcast %132 : vector<2x1x256xf32> to vector<2x4x256xf32>
    %135 = arith.mulf %133, %134 : vector<2x4x256xf32>
    %136 = arith.addf %129, %135 : vector<2x4x256xf32>
    %c0_19 = arith.constant 0 : index
    %c0_20 = arith.constant 0 : index
    %c0_21 = arith.constant 0 : index
    %137 = vector.load %arg3[%c0_19, %c0_20, %c0_21] : memref<2x4x256xf32, #tpu.memory_space<vmem>>, vector<2x4x256xf32>
    tpu.vector_store %arg3[%c0_19, %c0_20, %c0_21], %136 {strides = array<i32>} : memref<2x4x256xf32, #tpu.memory_space<vmem>>, vector<2x4x256xf32>,
    return
  }
  func.func @transform_0(%arg0: i32) -> (i32, i32, i32) {
    %c0_i32 = arith.constant 0 : i32
    %c0_i32_0 = arith.constant 0 : i32
    %c0_i32_1 = arith.constant 0 : i32
    %c0_i32_2 = arith.constant 0 : i32
    return %c0_i32, %c0_i32_0, %c0_i32_1 : i32, i32, i32
  }
  func.func @transform_1(%arg0: i32) -> (i32, i32) {
    %c0_i32 = arith.constant 0 : i32
    %c0_i32_0 = arith.constant 0 : i32
    %c0_i32_1 = arith.constant 0 : i32
    return %c0_i32, %c0_i32_0 : i32, i32
  }
  func.func @transform_2(%arg0: i32) -> (i32, i32, i32) {
    %c0_i32 = arith.constant 0 : i32
    %c0_i32_0 = arith.constant 0 : i32
    %c0_i32_1 = arith.constant 0 : i32
    %c0_i32_2 = arith.constant 0 : i32
    return %c0_i32, %c0_i32_0, %c0_i32_1 : i32, i32, i32
  }
}

</mosaic_0001>

<bundles_post_ra>
// kernel: tpu_custom_call.1
= control target key start
LH: loop header
LB: loop body
LE: loop exit
PB: predicated region body
PF: predicated region fallthrough
CT: control target
= control target key end

     0   :  { %7 = vsyncpa [#allocation3], 0  ;;  %s775_s0 = inlined_call_operand.hbm [shape: f32[2,4,256], index: 0, kind: input, shape index: {}]   ;;  %s776_s1 = inlined_call_operand.hbm [shape: f32[8,14], index: 1, kind: input, shape index: {}]   ;;  %s777_s2 = inlined_call_operand.hbm [shape: f32[2,4,256], index: 2, kind: output, shape index: {}]  }
   0x1   :  { %8 = vsyncpa [#allocation6], 0 }
   0x2   :  { %9 = vsyncpa [#allocation4], 0  ;;  %s14_s11 = sshll.u32 %s775_s0, 4  ;;  %s601_s12 = smov [#allocation2]   ;;  %s15_s11 = int_to_ptr.hbm [resolvable:$true] %s14_s11 }
   0x3   :  { %s16_s13 = sshll.u32 %s601_s12, 4  ;;  %s28_s16 = sshll.u32 %s776_s1, 4  ;;  %s17_s13 = int_to_ptr.vmem [resolvable:$true] %s16_s13  ;;  %s29_s16 = int_to_ptr.hbm [resolvable:$true] %s28_s16 }
   0x4   :  { %s602_s17 = smov 128   ;;  %s603_s18 = smov 8  }
   0x5   :  { %22 = dma.hbm_to_vmem [thread:$0]  %s15_s11, 256, %s17_s13, [#allocation3], %s602_s17, %s602_s17, %s603_s18  }
   0x6   :  { %s604_s19 = smov [#allocation5]  }
   0x7   :  { %s30_s20 = sshll.u32 %s604_s19, 4  ;;  %s31_s20 = int_to_ptr.vmem [resolvable:$true] %s30_s20 }
   0x8   :  { %33 = dma.hbm_to_vmem [thread:$0]  %s29_s16, 128, %s31_s20, [#allocation6]  }
   0x9   :  { %595 = dma.done.wait [#allocation3], 256  }
   0xa   :  { %596 = vsyncadd [#allocation3], 4294967040 }
   0xb   :  { %597 = dma.done.wait [#allocation6], 128  }
   0xc   :  { %598 = vsyncadd [#allocation6], 4294967168  ;;  %v605_v0 = vmov 0   ;;  %v606_v1 = vmov 1   ;;  %v607_v2 = vmov 3   ;;  %v44_v3 = vld [vmem:[#allocation5] sm:$0xff] }
   0xd   :  { %493 = vset.pattern.permute.xlu0 %v605_v0  ;;  %495 = vset.pattern.permute.xlu1 %v606_v1  ;;  %v608_v4 = vmov 4   ;;  %v609_v5 = vmov 2   ;;  %v610_v6 = vmov 5   ;;  %v611_v7 = vmov 13   ;;  %v42_v15 = vld [vmem:[#allocation2] sm:$0xff]  ;;  %v43_v16 = vld [vmem:[#allocation2 + $0x8] sm:$0xff] }
   0xe   :  { %497 = vset.pattern.permute.xlu2 %v607_v2  ;;  %51 = vperm.xlu0 %493, %v44_v3   ;;  %v612_v8 = vmov 7   ;;  %v613_v9 = vmov 6   ;;  %v614_v10 = vmov 8   ;;  %v615_v11 = vmov 12   ;;  %s620_s0 = smov [#allocation7]   ;;  %s459_s23 = sshll.u32 %s777_s2, 4  ;;  %s460_s23 = int_to_ptr.hbm [resolvable:$true] %s459_s23 }
   0xf   :  { %77 = vperm.xlu1 %495, %v44_v3   ;;  %125 = vperm.xlu2 %497, %v44_v3   ;;  %v616_v12 = vmov 9   ;;  %v617_v13 = vmov 10   ;;  %v618_v14 = vmov 11   ;;  %v128_v17 = vperm.slane %v42_v15, 3  ;;  %s457_s1 = sshll.u32 %s620_s0, 4  ;;  %s458_s1 = int_to_ptr.vmem [resolvable:$true] %s457_s1 }
  0x10   :  { %v129_v18 = vperm.slane %v42_v15, 7  ;;  %v130_v19 = vperm.slane %v43_v16, 3  ;;  %v131_v20 = vperm.slane %v43_v16, 7  ;;  %v56_v22 = vperm.slane %v42_v15, 0 }
  0x11   :  { %v57_v23 = vperm.slane %v42_v15, 4  ;;  %v58_v24 = vperm.slane %v43_v16, 0  ;;  %v59_v25 = vperm.slane %v43_v16, 4  ;;  %v80_v27 = vperm.slane %v42_v15, 1 }
  0x12   :  { %v81_v28 = vperm.slane %v42_v15, 5  ;;  %v82_v29 = vperm.slane %v43_v16, 1  ;;  %v83_v30 = vperm.slane %v43_v16, 5  ;;  %v104_v31 = vperm.slane %v42_v15, 2 }
  0x13   :  { %v105_v32 = vperm.slane %v42_v15, 6  ;;  %v106_v33 = vperm.slane %v43_v16, 2  ;;  %v107_v34 = vperm.slane %v43_v16, 6  ;;  %v136_v35 = vperm.slane %v128_v17, 3 }
  0x14   :  { %v137_v36 = vperm.slane %v129_v18, 3  ;;  %v138_v37 = vperm.slane %v130_v19, 3  ;;  %v139_v38 = vperm.slane %v131_v20, 3  ;;  %v64_v39 = vperm.slane %v56_v22, 0 }
  0x15   :  { %v65_v40 = vperm.slane %v57_v23, 0  ;;  %v66_v41 = vperm.slane %v58_v24, 0  ;;  %v67_v42 = vperm.slane %v59_v25, 0  ;;  %v88_v44 = vperm.slane %v80_v27, 1 }
  0x16   :  { %494 = vset.pattern.permute.xlu0 %v608_v4  ;;  %v89_v45 = vperm.slane %v81_v28, 1  ;;  %v90_v46 = vperm.slane %v82_v29, 1  ;;  %v91_v47 = vperm.slane %v83_v30, 1  ;;  %v112_v48 = vperm.slane %v104_v31, 2 }
  0x17   :  { %496 = vset.pattern.permute.xlu1 %v609_v5  ;;  %47 = vperm.xlu0 %494, %v44_v3   ;;  %v113_v49 = vperm.slane %v105_v32, 2  ;;  %v114_v50 = vperm.slane %v106_v33, 2  ;;  %v115_v51 = vperm.slane %v107_v34, 2 }
  0x18   :  { %101 = vperm.xlu1 %496, %v44_v3   ;;  %498 = vset.pattern.permute.xlu2 %v610_v6 }
  0x19   :  { %313 = vperm.xlu2 %498, %v44_v3  }
  0x1f   :  { %501 = vset.pattern.permute.xlu0 %v612_v8 }
  0x20   :  { %499 = vset.pattern.permute.xlu1 %v611_v7  ;;  %345 = vperm.xlu0 %501, %v44_v3  }
  0x21   :  { %309 = vperm.xlu1 %499, %v44_v3   ;;  %500 = vset.pattern.permute.xlu2 %v613_v9 }
  0x22   :  { %329 = vperm.xlu2 %500, %v44_v3  }
  0x28   :  { %506 = vset.pattern.permute.xlu0 %v615_v11 }
  0x29   :  { %502 = vset.pattern.permute.xlu1 %v614_v10  ;;  %425 = vperm.xlu0 %506, %v44_v3  }
  0x2a   :  { %361 = vperm.xlu1 %502, %v44_v3   ;;  %503 = vset.pattern.permute.xlu2 %v616_v12 }
  0x2b   :  { %377 = vperm.xlu2 %503, %v44_v3  }
  0x32   :  { %504 = vset.pattern.permute.xlu1 %v617_v13 }
  0x33   :  { %393 = vperm.xlu1 %504, %v44_v3   ;;  %505 = vset.pattern.permute.xlu2 %v618_v14 }
  0x34   :  { %409 = vperm.xlu2 %505, %v44_v3  }
  0x69   :  { %v126_v43 = vpop.permute.xlu2 %125 }
  0x6a   :  { %v140_v52 = vmul.f32 %v136_v35, %v126_v43  ;;  %v141_v53 = vmul.f32 %v137_v36, %v126_v43  ;;  %v142_v54 = vmul.f32 %v138_v37, %v126_v43  ;;  %v143_v55 = vmul.f32 %v139_v38, %v126_v43 }
  0x80   :  { %v52_v21 = vpop.permute.xlu0 %51 }
  0x81   :  { %v78_v26 = vpop.permute.xlu1 %77  ;;  %v68_v56 = vmul.f32 %v64_v39, %v52_v21  ;;  %v69_v57 = vmul.f32 %v65_v40, %v52_v21  ;;  %v70_v58 = vmul.f32 %v66_v41, %v52_v21  ;;  %v71_v59 = vmul.f32 %v67_v42, %v52_v21 }
  0x82   :  { %v92_v60 = vmul.f32 %v88_v44, %v78_v26  ;;  %v93_v61 = vmul.f32 %v89_v45, %v78_v26  ;;  %v94_v62 = vmul.f32 %v90_v46, %v78_v26  ;;  %v95_v63 = vmul.f32 %v91_v47, %v78_v26 }
  0x89   :  { %v48_v0 = vpop.permute.xlu0 %47 }
  0x8a   :  { %v102_v1 = vpop.permute.xlu1 %101  ;;  %v72_v2 = vadd.f32 %v68_v56, %v48_v0  ;;  %v73_v3 = vadd.f32 %v69_v57, %v48_v0  ;;  %v74_v4 = vadd.f32 %v70_v58, %v48_v0  ;;  %v75_v5 = vadd.f32 %v71_v59, %v48_v0 }
  0x8b   :  { %v116_v6 = vmul.f32 %v112_v48, %v102_v1  ;;  %v117_v7 = vmul.f32 %v113_v49, %v102_v1  ;;  %v118_v8 = vmul.f32 %v114_v50, %v102_v1  ;;  %v119_v9 = vmul.f32 %v115_v51, %v102_v1 }
  0x8c   :  { %v96_v10 = vadd.f32 %v92_v60, %v72_v2  ;;  %v97_v11 = vadd.f32 %v93_v61, %v73_v3  ;;  %v98_v12 = vadd.f32 %v94_v62, %v74_v4  ;;  %v99_v13 = vadd.f32 %v95_v63, %v75_v5 }
  0x8e   :  { %v120_v14 = vadd.f32 %v116_v6, %v96_v10  ;;  %v121_v15 = vadd.f32 %v117_v7, %v97_v11  ;;  %v122_v16 = vadd.f32 %v118_v8, %v98_v12  ;;  %v123_v17 = vadd.f32 %v119_v9, %v99_v13 }
  0x90   :  { %v645_v18 = vadd.f32 %v140_v52, %v120_v14  ;;  %v647_v19 = vadd.f32 %v141_v53, %v121_v15  ;;  %v649_v20 = vadd.f32 %v142_v54, %v122_v16  ;;  %v651_v21 = vadd.f32 %v143_v55, %v123_v17 }
  0x92   :  { %v654_v22 = vmul.f32 0.70710677, %v645_v18  ;;  %v657_v23 = vmul.f32 0.70710677, %v647_v19  ;;  %v660_v24 = vmul.f32 0.70710677, %v649_v20 }
  0x93   :  { %v663_v25 = vmul.f32 0.70710677, %v651_v21 }
  0x94   :  { %v666_v26 = vand.u32 2147483647, %v654_v22  ;;  %v669_v27 = vand.u32 2147483647, %v657_v23  ;;  %v672_v28 = vand.u32 2147483647, %v660_v24 }
  0x95   :  { %v675_v29 = vand.u32 2147483647, %v663_v25 }
  0x96   :  { %v168_v30 = vmul.f32 0.3275911, %v666_v26  ;;  %v169_v31 = vmul.f32 0.3275911, %v669_v27  ;;  %v170_v32 = vmul.f32 0.3275911, %v672_v28 }
  0x97   :  { %v171_v33 = vmul.f32 0.3275911, %v675_v29  ;;  %v272_v44 = vsub.f32 0.0, %v666_v26  ;;  %v273_v45 = vsub.f32 0.0, %v669_v27 }
  0x98   :  { %v172_v34 = vadd.f32 1.0, %v168_v30  ;;  %v173_v35 = vadd.f32 1.0, %v169_v31  ;;  %v174_v36 = vadd.f32 1.0, %v170_v32  ;;  %v274_v30 = vsub.f32 0.0, %v672_v28 }
  0x99   :  { %v681_v37 = vadd.f32 1.0, %v171_v33 }
  0x9a   :  { %507 = vrcp.f32 %v172_v34  ;;  %v185_v38 = vand.u32 2147483647, %v172_v34  ;;  %v187_v40 = vand.u32 2147483648, %v172_v34  ;;  %v200_v41 = vand.u32 2147483647, %v173_v35 }
  0x9b   :  { %509 = vrcp.f32 %v173_v35  ;;  %vm181_vm0 = vweird.f32 %v172_v34  ;;  %vm196_vm1 = vweird.f32 %v173_v35  ;;  %v202_v48 = vand.u32 2147483648, %v173_v35 }
  0x9c   :  { %511 = vrcp.f32 %v174_v36  ;;  %vm686_vm2 = vcmp.eq.f32.partialorder %v185_v38, 8.507059e+37  ;;  %vm211_vm3 = vweird.f32 %v174_v36  ;;  %v188_v53 = vor.u32 1.1754944e-38, %v187_v40 }
  0x9d   :  { %513 = vrcp.f32 %v681_v37  ;;  %vm690_vm4 = vcmp.eq.f32.partialorder %v200_v41, 8.507059e+37  ;;  %v215_v56 = vand.u32 2147483647, %v174_v36  ;;  %v203_v61 = vor.u32 1.1754944e-38, %v202_v48 }
  0x9e   :  { %v217_v62 = vand.u32 2147483648, %v174_v36  ;;  %vm226_vm9 = vweird.f32 %v681_v37  ;;  %v230_v3 = vand.u32 2147483647, %v681_v37  ;;  %v232_v4 = vand.u32 2147483648, %v681_v37 }
  0x9f   :  { %vm216_vm13 = vcmp.eq.f32.partialorder %v215_v56, 8.507059e+37  ;;  %v276_v38 = vmul.f32 %v272_v44, %v666_v26  ;;  %v713_v56 = vpop.permute.xlu2 %313 }
  0xa0   :  { %v508_v39 = vpop.eup %507  ;;  %v218_v10 = vor.u32 1.1754944e-38, %v217_v62  ;;  %v233_v16 = vor.u32 1.1754944e-38, %v232_v4  ;;  %vm231_vm15 = vcmp.eq.f32.partialorder %v230_v3, 8.507059e+37 }
  0xa1   :  { %v510_v42 = vpop.eup %509  ;;  %v177_v43 = vmul.f32 %v508_v39, %v172_v34  ;;  %vm182_vm5 = vweird.f32 %v508_v39 }
  0xa2   :  { %v512_v46 = vpop.eup %511  ;;  %v192_v47 = vmul.f32 %v510_v42, %v173_v35  ;;  %vm197_vm6 = vweird.f32 %v510_v42  ;;  %vm183_vm8 = vmor %vm181_vm0, %vm182_vm5  ;;  %vm156_vm0 = vcmp.ge.f32.partialorder %v654_v22, 0.0 }
  0xa3   :  { %v178_v49 = vsub.f32 1.0, %v177_v43  ;;  %v207_v51 = vmul.f32 %v512_v46, %v174_v36  ;;  %v514_v52 = vpop.eup %513  ;;  %vm212_vm7 = vweird.f32 %v512_v46  ;;  %vm198_vm10 = vmor %vm196_vm1, %vm197_vm6  ;;  %v275_v36 = vsub.f32 0.0, %v675_v29 }
  0xa4   :  { %v193_v54 = vsub.f32 1.0, %v192_v47  ;;  %v222_v59 = vmul.f32 %v514_v52, %v681_v37  ;;  %vm227_vm11 = vweird.f32 %v514_v52  ;;  %vm213_vm12 = vmor %vm211_vm3, %vm212_vm7  ;;  %v277_v37 = vmul.f32 %v273_v45, %v669_v27 }
  0xa5   :  { %v179_v57 = vmul.f32 %v508_v39, %v178_v49  ;;  %v208_v58 = vsub.f32 1.0, %v207_v51  ;;  %vm228_vm14 = vmor %vm226_vm9, %vm227_vm11  ;;  %v278_v43 = vmul.f32 %v274_v30, %v672_v28  ;;  %v279_v50 = vmul.f32 %v275_v36, %v675_v29 }
  0xa6   :  { %v194_v60 = vmul.f32 %v510_v42, %v193_v54  ;;  %v223_v1 = vsub.f32 1.0, %v222_v59  ;;  %v280_v51 = vmul.f32 1.442695, %v276_v38  ;;  %v282_v55 = vmul.f32 1.442695, %v277_v37 }
  0xa7   :  { %v180_v63 = vadd.f32 %v508_v39, %v179_v57  ;;  %v209_v0 = vmul.f32 %v512_v46, %v208_v58  ;;  %v284_v44 = vmul.f32 1.442695, %v278_v43  ;;  %v286_v28 = vmul.f32 1.442695, %v279_v50 }
  0xa8   :  { %v195_v2 = vadd.f32 %v510_v42, %v194_v60  ;;  %v224_v7 = vmul.f32 %v514_v52, %v223_v1  ;;  %515 = vpow2.f32 %v280_v51  ;;  %vm157_vm1 = vcmp.ge.f32.partialorder %v657_v23, 0.0  ;;  %v310_v23 = vpop.permute.xlu1 %309 }
  0xa9   :  { %v184_v5 = vsel %vm183_vm8, %v508_v39, %v180_v63  ;;  %v210_v6 = vadd.f32 %v512_v46, %v209_v0  ;;  %517 = vpow2.f32 %v282_v55  ;;  %vm159_vm3 = vcmp.ge.f32.partialorder %v663_v25, 0.0 }
  0xaa   :  { %v189_v8 = vsel %vm686_vm2, %v188_v53, %v184_v5  ;;  %v199_v9 = vsel %vm198_vm10, %v510_v42, %v195_v2  ;;  %v225_v13 = vadd.f32 %v514_v52, %v224_v7  ;;  %519 = vpow2.f32 %v284_v44 }
  0xab   :  { %v204_v11 = vsel %vm690_vm4, %v203_v61, %v199_v9  ;;  %v214_v12 = vsel %vm213_vm12, %v512_v46, %v210_v6  ;;  %v236_v14 = vmul.f32 1.0614054, %v189_v8  ;;  %521 = vpow2.f32 %v286_v28 }
  0xac   :  { %v219_v15 = vsel %vm216_vm13, %v218_v10, %v214_v12  ;;  %v237_v17 = vmul.f32 1.0614054, %v204_v11  ;;  %v229_v31 = vsel %vm228_vm14, %v514_v52, %v225_v13  ;;  %vm158_vm2 = vcmp.ge.f32.partialorder %v660_v24, 0.0 }
  0xad   :  { %v238_v32 = vmul.f32 1.0614054, %v219_v15  ;;  %v240_v33 = vadd.f32 -1.4531521, %v236_v14  ;;  %v234_v34 = vsel %vm231_vm15, %v233_v16, %v229_v31  ;;  %v330_v16 = vpop.permute.xlu2 %329  ;;  %v149_v37 = vmul.f32 0.5, %v647_v19 }
  0xae   :  { %v241_v35 = vadd.f32 -1.4531521, %v237_v17  ;;  %v239_v39 = vmul.f32 1.0614054, %v234_v34  ;;  %v516_v5 = vpop.eup %515  ;;  %v151_v50 = vmul.f32 0.5, %v651_v21  ;;  %vm446_vm4 = vcmask 1043456  }
  0xaf   :  { %v242_v40 = vadd.f32 -1.4531521, %v238_v32  ;;  %v244_v41 = vmul.f32 %v240_v33, %v189_v8  ;;  %v518_v7 = vpop.eup %517 }
  0xb0   :  { %v245_v42 = vmul.f32 %v241_v35, %v204_v11  ;;  %v243_v46 = vadd.f32 -1.4531521, %v239_v39  ;;  %v520_v13 = vpop.eup %519 }
  0xb1   :  { %v246_v47 = vmul.f32 %v242_v40, %v219_v15  ;;  %v248_v48 = vadd.f32 1.4214138, %v244_v41  ;;  %v522_v32 = vpop.eup %521  ;;  %v148_v40 = vmul.f32 0.5, %v645_v18 }
  0xb2   :  { %v249_v49 = vadd.f32 1.4214138, %v245_v42  ;;  %v247_v52 = vmul.f32 %v243_v46, %v234_v34  ;;  %v150_v46 = vmul.f32 0.5, %v649_v20 }
  0xb3   :  { %v250_v53 = vadd.f32 1.4214138, %v246_v47  ;;  %v252_v54 = vmul.f32 %v248_v48, %v189_v8 }
  0xb4   :  { %v253_v26 = vmul.f32 %v249_v49, %v204_v11  ;;  %v251_v57 = vadd.f32 1.4214138, %v247_v52 }
  0xb5   :  { %v254_v27 = vmul.f32 %v250_v53, %v219_v15  ;;  %v256_v45 = vadd.f32 -0.28449672, %v252_v54  ;;  %v378_v20 = vpop.permute.xlu2 %377 }
  0xb6   :  { %v257_v58 = vadd.f32 -0.28449672, %v253_v26  ;;  %v255_v59 = vmul.f32 %v251_v57, %v234_v34 }
  0xb7   :  { %v258_v60 = vadd.f32 -0.28449672, %v254_v27  ;;  %v260_v61 = vmul.f32 %v256_v45, %v189_v8 }
  0xb8   :  { %v261_v29 = vmul.f32 %v257_v58, %v204_v11  ;;  %v259_v62 = vadd.f32 -0.28449672, %v255_v59 }
  0xb9   :  { %v262_v63 = vmul.f32 %v258_v60, %v219_v15  ;;  %v264_v0 = vadd.f32 0.2548296, %v260_v61 }
  0xba   :  { %v265_v1 = vadd.f32 0.2548296, %v261_v29  ;;  %v263_v2 = vmul.f32 %v259_v62, %v234_v34 }
  0xbb   :  { %v266_v3 = vadd.f32 0.2548296, %v262_v63  ;;  %v268_v4 = vmul.f32 %v264_v0, %v189_v8  ;;  %v619_v8 = vmov -1.0  }
  0xbc   :  { %v269_v6 = vmul.f32 %v265_v1, %v204_v11  ;;  %v267_v9 = vadd.f32 0.2548296, %v263_v2  ;;  %v160_v11 = vsel %vm156_vm0, 1.0, %v619_v8  ;;  %v161_v22 = vsel %vm157_vm1, 1.0, %v619_v8  ;;  %v362_v2 = vpop.permute.xlu1 %361 }
  0xbd   :  { %v270_v10 = vmul.f32 %v266_v3, %v219_v15  ;;  %v288_v12 = vmul.f32 %v516_v5, %v268_v4  ;;  %v162_v38 = vsel %vm158_vm2, 1.0, %v619_v8  ;;  %v163_v42 = vsel %vm159_vm3, 1.0, %v619_v8  ;;  %v346_v8 = vpop.permute.xlu0 %345 }
  0xbe   :  { %v289_v14 = vmul.f32 %v518_v7, %v269_v6  ;;  %v271_v17 = vmul.f32 %v267_v9, %v234_v34 }
  0xbf   :  { %v290_v30 = vmul.f32 %v520_v13, %v270_v10  ;;  %v292_v31 = vsub.f32 1.0, %v288_v12 }
  0xc0   :  { %v293_v33 = vsub.f32 1.0, %v289_v14  ;;  %v291_v35 = vmul.f32 %v522_v32, %v271_v17 }
  0xc1   :  { %v294_v15 = vsub.f32 1.0, %v290_v30  ;;  %v296_v36 = vmul.f32 %v292_v31, %v160_v11 }
  0xc2   :  { %v297_v39 = vmul.f32 %v293_v33, %v161_v22  ;;  %v295_v41 = vsub.f32 1.0, %v291_v35 }
  0xc3   :  { %v298_v24 = vmul.f32 %v294_v15, %v162_v38  ;;  %v300_v34 = vadd.f32 1.0, %v296_v36 }
  0xc4   :  { %v301_v43 = vadd.f32 1.0, %v297_v39  ;;  %v299_v47 = vmul.f32 %v295_v41, %v163_v42 }
  0xc5   :  { %v302_v48 = vadd.f32 1.0, %v298_v24  ;;  %v724_v49 = vmul.f32 %v300_v34, %v148_v40 }
  0xc6   :  { %v727_v51 = vmul.f32 %v301_v43, %v149_v37  ;;  %v303_v18 = vadd.f32 1.0, %v299_v47 }
  0xc7   :  { %v729_v52 = vmul.f32 %v302_v48, %v150_v46  ;;  %v316_v53 = vperm.slane %v724_v49, 0  ;;  %v332_v19 = vperm.slane %v724_v49, 1  ;;  %v380_v55 = vperm.slane %v724_v49, 4 }
  0xc8   :  { %v317_v25 = vperm.slane %v727_v51, 0  ;;  %v333_v54 = vperm.slane %v727_v51, 1  ;;  %v736_v26 = vmul.f32 %v303_v18, %v151_v50  ;;  %v381_v58 = vperm.slane %v727_v51, 4 }
  0xc9   :  { %v318_v21 = vperm.slane %v729_v52, 0  ;;  %v320_v44 = vmul.f32 %v316_v53, %v713_v56  ;;  %v334_v57 = vperm.slane %v729_v52, 1  ;;  %v336_v45 = vmul.f32 %v332_v19, %v330_v16 }
  0xca   :  { %v321_v27 = vmul.f32 %v317_v25, %v713_v56  ;;  %v382_v28 = vperm.slane %v729_v52, 4  ;;  %v319_v59 = vperm.slane %v736_v26, 0  ;;  %v335_v61 = vperm.slane %v736_v26, 1 }
  0xcb   :  { %v322_v60 = vmul.f32 %v318_v21, %v713_v56  ;;  %v337_v29 = vmul.f32 %v333_v54, %v330_v16  ;;  %v338_v62 = vmul.f32 %v334_v57, %v330_v16  ;;  %v324_v63 = vadd.f32 %v320_v44, %v310_v23  ;;  %v394_v54 = vpop.permute.xlu1 %393 }
  0xcc   :  { %v325_v0 = vadd.f32 %v321_v27, %v310_v23  ;;  %v383_v1 = vperm.slane %v736_v26, 4  ;;  %v323_v3 = vmul.f32 %v319_v59, %v713_v56  ;;  %v339_v4 = vmul.f32 %v335_v61, %v330_v16 }
  0xcd   :  { %v326_v5 = vadd.f32 %v322_v60, %v310_v23  ;;  %v384_v6 = vmul.f32 %v380_v55, %v378_v20  ;;  %v340_v7 = vadd.f32 %v336_v45, %v324_v63  ;;  %v385_v10 = vmul.f32 %v381_v58, %v378_v20 }
  0xce   :  { %v341_v9 = vadd.f32 %v337_v29, %v325_v0  ;;  %v386_v12 = vmul.f32 %v382_v28, %v378_v20  ;;  %v327_v13 = vadd.f32 %v323_v3, %v310_v23  ;;  %v387_v14 = vmul.f32 %v383_v1, %v378_v20  ;;  %v410_v23 = vpop.permute.xlu2 %409 }
  0xcf   :  { %v364_v17 = vperm.slane %v724_v49, 3  ;;  %v365_v30 = vperm.slane %v727_v51, 3  ;;  %v366_v31 = vperm.slane %v729_v52, 3  ;;  %v367_v32 = vperm.slane %v736_v26, 3 }
  0xd0   :  { %v348_v56 = vperm.slane %v724_v49, 2  ;;  %v349_v16 = vperm.slane %v727_v51, 2  ;;  %v342_v11 = vadd.f32 %v338_v62, %v326_v5  ;;  %v343_v33 = vadd.f32 %v339_v4, %v327_v13 }
  0xd1   :  { %v368_v22 = vmul.f32 %v364_v17, %v362_v2  ;;  %v350_v35 = vperm.slane %v729_v52, 2  ;;  %v369_v15 = vmul.f32 %v365_v30, %v362_v2  ;;  %v370_v36 = vmul.f32 %v366_v31, %v362_v2 }
  0xd2   :  { %v351_v38 = vperm.slane %v736_v26, 2  ;;  %v352_v39 = vmul.f32 %v348_v56, %v346_v8  ;;  %v353_v40 = vmul.f32 %v349_v16, %v346_v8  ;;  %v412_v24 = vperm.slane %v724_v49, 6 }
  0xd3   :  { %v354_v41 = vmul.f32 %v350_v35, %v346_v8  ;;  %v413_v34 = vperm.slane %v727_v51, 6  ;;  %v371_v37 = vmul.f32 %v367_v32, %v362_v2  ;;  %v414_v46 = vperm.slane %v729_v52, 6  ;;  %v426_v2 = vpop.permute.xlu0 %425 }
  0xd4   :  { %v355_v42 = vmul.f32 %v351_v38, %v346_v8  ;;  %v356_v43 = vadd.f32 %v352_v39, %v340_v7  ;;  %v357_v47 = vadd.f32 %v353_v40, %v341_v9  ;;  %v415_v50 = vperm.slane %v736_v26, 6 }
  0xd5   :  { %v358_v48 = vadd.f32 %v354_v41, %v342_v11  ;;  %v416_v18 = vmul.f32 %v412_v24, %v410_v23  ;;  %v417_v19 = vmul.f32 %v413_v34, %v410_v23  ;;  %v418_v25 = vmul.f32 %v414_v46, %v410_v23 }
  0xd6   :  { %v359_v53 = vadd.f32 %v355_v42, %v343_v33  ;;  %v372_v20 = vadd.f32 %v368_v22, %v356_v43  ;;  %v373_v55 = vadd.f32 %v369_v15, %v357_v47  ;;  %v396_v44 = vperm.slane %v724_v49, 5 }
  0xd7   :  { %v374_v21 = vadd.f32 %v370_v36, %v358_v48  ;;  %v397_v57 = vperm.slane %v727_v51, 5  ;;  %v398_v58 = vperm.slane %v729_v52, 5  ;;  %v399_v28 = vperm.slane %v736_v26, 5 }
  0xd8   :  { %v375_v27 = vadd.f32 %v371_v37, %v359_v53  ;;  %v388_v45 = vadd.f32 %v384_v6, %v372_v20  ;;  %v389_v59 = vadd.f32 %v385_v10, %v373_v55  ;;  %v400_v61 = vmul.f32 %v396_v44, %v394_v54 }
  0xd9   :  { %v390_v60 = vadd.f32 %v386_v12, %v374_v21  ;;  %v401_v29 = vmul.f32 %v397_v57, %v394_v54  ;;  %v419_v62 = vmul.f32 %v415_v50, %v410_v23  ;;  %v402_v0 = vmul.f32 %v398_v58, %v394_v54 }
  0xda   :  { %v391_v63 = vadd.f32 %v387_v14, %v375_v27  ;;  %v403_v1 = vmul.f32 %v399_v28, %v394_v54  ;;  %v404_v3 = vadd.f32 %v400_v61, %v388_v45  ;;  %v428_v5 = vperm.slane %v724_v49, 7 }
  0xdb   :  { %v405_v4 = vadd.f32 %v401_v29, %v389_v59  ;;  %v429_v7 = vperm.slane %v727_v51, 7  ;;  %v406_v6 = vadd.f32 %v402_v0, %v390_v60  ;;  %v430_v13 = vperm.slane %v729_v52, 7 }
  0xdc   :  { %v407_v9 = vadd.f32 %v403_v1, %v391_v63  ;;  %v431_v10 = vperm.slane %v736_v26, 7  ;;  %v420_v12 = vadd.f32 %v416_v18, %v404_v3  ;;  %v432_v8 = vmul.f32 %v428_v5, %v426_v2 }
  0xdd   :  { %v421_v17 = vadd.f32 %v417_v19, %v405_v4  ;;  %v433_v30 = vmul.f32 %v429_v7, %v426_v2  ;;  %v422_v31 = vadd.f32 %v418_v25, %v406_v6  ;;  %v434_v16 = vmul.f32 %v430_v13, %v426_v2 }
  0xde   :  { %v423_v14 = vadd.f32 %v419_v62, %v407_v9  ;;  %v435_v32 = vmul.f32 %v431_v10, %v426_v2  ;;  %v436_v49 = vadd.f32 %v432_v8, %v420_v12 }
  0xdf   :  { %v437_v56 = vadd.f32 %v433_v30, %v421_v17  ;;  %v438_v52 = vadd.f32 %v434_v16, %v422_v31 }
  0xe0   :  { %v439_v11 = vadd.f32 %v435_v32, %v423_v14 }
  0xe1   :  { %v444_v51 = vrot.slane %v437_v56, 4 }
  0xe2   :  { %v445_v26 = vrot.slane %v439_v11, 4 }
  0xe3   :  { %v447_v33 = vsel %vm446_vm4, %v436_v49, %v444_v51 }
  0xe4   :  { %v448_v22 = vsel %vm446_vm4, %v438_v52, %v445_v26  ;;  %451 = vst [vmem:[#allocation7] sm:$0xff] %v447_v33 }
  0xe5   :  { %452 = vst [vmem:[#allocation7 + $0x8] sm:$0xff] %v448_v22 }
  0xe6   :  { %465 = dma.vmem_to_hbm [thread:$0]  %s458_s1, 256, %s460_s23, [#allocation4], %s602_s17, %s602_s17, %s603_s18  }
  0xe7   :  { %599 = dma.done.wait [#allocation4], 256  }
  0xe8   :  { %600 = vsyncadd [#allocation4], 4294967040 }
  0xe9   :  { %470 = vsyncpa [#allocation3], 1 }
  0xea   :  { %471 = vsyncpa [#allocation6], 1 }
  0xeb   :  { %472 = vsyncpa [#allocation4], 1 }

</bundles_post_ra>
